<compile_context>
chip_gen: v5e
topology: v5e:2x2
jax: 0.10.0
libtpu: 0.0.40
codegen_flags: <defaults>
</compile_context>

<pallas_src>
import functools

import jax
import jax.numpy as jnp
from jax import lax
from jax.experimental import pallas as pl
from jax.experimental.pallas import tpu as pltpu

_NEG_INF = -1e30  # finite "minus infinity" keeps exp()/max() NaN-free


def _flash_attn_kernel(*refs, scale: float, compute_dtype, has_kbias: bool):
    """One (batch, q-tile, k-tile) grid step of online-softmax attention."""
    if has_kbias:
        (q_ref, k_ref, v_ref, kbias_ref, o_ref,
         qs_scr, m_scr, l_scr, acc_scr) = refs
    else:
        (q_ref, k_ref, v_ref, o_ref,
         qs_scr, m_scr, l_scr, acc_scr) = refs
        kbias_ref = None

    kv = pl.program_id(2)
    nk = pl.num_programs(2)

    @pl.when(kv == 0)
    def _init():
        # Q block is invariant across the kv axis: scale + downcast it ONCE
        # per q-tile into VMEM scratch (hoists nk-1 redundant VPU passes).
        qs_scr[...] = (q_ref[...].astype(jnp.float32)
                       * jnp.float32(scale)).astype(compute_dtype)
        m_scr[...] = jnp.full_like(m_scr, _NEG_INF)
        l_scr[...] = jnp.zeros_like(l_scr)
        acc_scr[...] = jnp.zeros_like(acc_scr)

    q = qs_scr[...]                                   # (tq, H) compute_dtype
    k = k_ref[...].astype(compute_dtype)              # (tk, H)
    v = v_ref[...].astype(compute_dtype)              # (tk, H)

    # Scores: contract the shared head dim directly (no explicit k.T);
    # bf16 MXU operands, f32 accumulation.
    s = lax.dot_general(q, k, dimension_numbers=(((1,), (1,)), ((), ())),
                        preferred_element_type=jnp.float32)      # (tq, tk) f32

    if has_kbias:
        # Precomputed additive mask row: 0 for valid keys, -1e30 for the
        # zero-padded tail keys (only the last kv tile has non-zero entries).
        s = s + kbias_ref[...]                         # (1, tk) broadcast add

    # Online (streaming) softmax update — all f32 on the VPU.
    m_prev = m_scr[...]                                # (tq, 1)
    m_new = jnp.maximum(m_prev, jnp.max(s, axis=-1, keepdims=True))
    alpha = jnp.exp(m_prev - m_new)
    p = jnp.exp(s - m_new)                             # (tq, tk)
    l_scr[...] = alpha * l_scr[...] + jnp.sum(p, axis=-1, keepdims=True)
    acc_scr[...] = alpha * acc_scr[...] + jnp.dot(
        p.astype(compute_dtype), v, preferred_element_type=jnp.float32)
    m_scr[...] = m_new

    @pl.when(kv == nk - 1)
    def _finalize():
        inv_l = pl.reciprocal(l_scr[...], approx=True)  # EUP vrcp
        o_ref[...] = (acc_scr[...] * inv_l).astype(o_ref.dtype)


def attention(q: jax.Array, k: jax.Array, v: jax.Array, *,
              q_tile: int | None = None, k_tile: int | None = None,
              compute_dtype=jnp.bfloat16) -> jax.Array:
    """Scaled dot-product attention. q:(B,Tq,H) k,v:(B,Tk,H) -> (B,Tq,H)."""
    B, Tq, H = q.shape
    _, Tk, _ = k.shape
    assert k.shape == (B, Tk, H) and v.shape == (B, Tk, H)

    scale = float(H) ** -0.5

    # ---- Tile selection.  Head dim is never padded (H is the full last block
    # dim).  Large tiles cut K/V re-streaming; when B == 1 keep smaller
    # q-tiles so the parallel grid extent stays >= 2 for v7x's two cores.
    tq_pref = q_tile if q_tile is not None else (512 if B >= 2 else 256)
    tk_pref = k_tile if k_tile is not None else 512
    assert tq_pref % 128 == 0 and tk_pref % 128 == 0

    tq = Tq if Tq <= tq_pref else tq_pref   # full-extent block for short seqs
    tk = Tk if Tk <= tk_pref else tk_pref

    nq = -(-Tq // tq)
    nk = -(-Tk // tk)
    Tq_pad = nq * tq
    Tk_pad = nk * tk
    ragged_q = Tq_pad != Tq
    ragged_k = Tk_pad != Tk

    # Only long, non-divisible sequences pay a (<1 tile) zero-pad along the
    # sequence dim; the padded keys are masked via an additive bias row.
    qin = jnp.pad(q, ((0, 0), (0, Tq_pad - Tq), (0, 0))) if ragged_q else q
    kin = jnp.pad(k, ((0, 0), (0, Tk_pad - Tk), (0, 0))) if ragged_k else k
    vin = jnp.pad(v, ((0, 0), (0, Tk_pad - Tk), (0, 0))) if ragged_k else v

    inputs = [qin, kin, vin]
    in_specs = [
        pl.BlockSpec((pl.Squeezed(), tq, H), lambda b, qi, kv: (b, qi, 0)),
        pl.BlockSpec((pl.Squeezed(), tk, H), lambda b, qi, kv: (b, kv, 0)),
        pl.BlockSpec((pl.Squeezed(), tk, H), lambda b, qi, kv: (b, kv, 0)),
    ]
    if ragged_k:
        kbias = jnp.where(jnp.arange(Tk_pad) < Tk, 0.0, _NEG_INF)
        kbias = kbias.astype(jnp.float32).reshape(1, Tk_pad)
        inputs.append(kbias)
        in_specs.append(pl.BlockSpec((1, tk), lambda b, qi, kv: (0, kv)))

    kernel = functools.partial(_flash_attn_kernel, scale=scale,
                               compute_dtype=compute_dtype,
                               has_kbias=ragged_k)

    itemsize = q.dtype.itemsize
    out_pad = pl.pallas_call(
        kernel,
        out_shape=jax.ShapeDtypeStruct((B, Tq_pad, H), q.dtype),
        grid_spec=pltpu.PrefetchScalarGridSpec(
            num_scalar_prefetch=0,
            grid=(B, nq, nk),
            in_specs=in_specs,
            out_specs=pl.BlockSpec((pl.Squeezed(), tq, H),
                                   lambda b, qi, kv: (b, qi, 0)),
            scratch_shapes=[
                pltpu.VMEM((tq, H), compute_dtype),   # scaled Q (hoisted)
                pltpu.VMEM((tq, 1), jnp.float32),     # running max  m
                pltpu.VMEM((tq, 1), jnp.float32),     # running sum  l
                pltpu.VMEM((tq, H), jnp.float32),     # output accumulator
            ],
        ),
        compiler_params=pltpu.CompilerParams(
            dimension_semantics=("parallel", "parallel", "arbitrary"),
            # Above v5e's 16 MiB scoped default, below v7x's 64 MiB physical.
            vmem_limit_bytes=48 * 1024 * 1024,
        ),
        cost_estimate=pl.CostEstimate(
            flops=4 * B * Tq_pad * Tk_pad * H,
            transcendentals=B * Tq_pad * Tk_pad,
            # Q read + output write once; K and V re-streamed once per q-tile.
            bytes_accessed=(2 * B * Tq_pad * H * itemsize
                            + nq * B * Tk_pad * H * 2 * itemsize),
        ),
    )(*inputs)

    return out_pad[:, :Tq, :] if ragged_q else out_pad


def _reference(q, k, v):
    scale = 1.0 / jnp.sqrt(jnp.float32(q.shape[-1]))
    s = jnp.einsum("bqh,bkh->bqk", q.astype(jnp.float32),
                   k.astype(jnp.float32)) * scale
    p = jax.nn.softmax(s, axis=-1)
    return jnp.einsum("bqk,bkh->bqh", p, v.astype(jnp.float32)).astype(q.dtype)


if __name__ == "__main__":
    # bf16 MXU operands + approx reciprocal => compare at bf16-level tolerance.
    ATOL = RTOL = 2e-2

    # Primary small test (shapes implied by the module: seq=8, hidden=32).
    kq, kk, kv = jax.random.split(jax.random.PRNGKey(0), 3)
    B, Tq, Tk, H = 2, 8, 8, 32
    q = jax.random.normal(kq, (B, Tq, H), dtype=jnp.float32)
    k = jax.random.normal(kk, (B, Tk, H), dtype=jnp.float32)
    v = jax.random.normal(kv, (B, Tk, H), dtype=jnp.float32)

    out = attention(q, k, v)
    jax.block_until_ready(out)
    ref = _reference(q, k, v)
    assert out.shape == (B, Tq, H)
    assert jnp.allclose(out, ref, atol=ATOL, rtol=RTOL)

    # Secondary test: odd (non 8/128-aligned) full-extent blocks, no padding.
    k2q, k2k, k2v = jax.random.split(jax.random.PRNGKey(1), 3)
    B2, Tq2, Tk2, H2 = 2, 20, 37, 32
    q2 = jax.random.normal(k2q, (B2, Tq2, H2), dtype=jnp.float32)
    k2 = jax.random.normal(k2k, (B2, Tk2, H2), dtype=jnp.float32)
    v2 = jax.random.normal(k2v, (B2, Tk2, H2), dtype=jnp.float32)

    out2 = attention(q2, k2, v2)
    jax.block_until_ready(out2)
    ref2 = _reference(q2, k2, v2)
    assert out2.shape == (B2, Tq2, H2)
    assert jnp.allclose(out2, ref2, atol=ATOL, rtol=RTOL)

    # Third test: exercises the tiled path (multi q/k tiles, ragged edges,
    # key-bias masking, online-softmax accumulation across kv tiles).
    k3q, k3k, k3v = jax.random.split(jax.random.PRNGKey(2), 3)
    B3, Tq3, Tk3, H3 = 1, 300, 200, 32
    q3 = jax.random.normal(k3q, (B3, Tq3, H3), dtype=jnp.float32)
    k3 = jax.random.normal(k3k, (B3, Tk3, H3), dtype=jnp.float32)
    v3 = jax.random.normal(k3v, (B3, Tk3, H3), dtype=jnp.float32)

    out3 = attention(q3, k3, v3, q_tile=128, k_tile=128)
    jax.block_until_ready(out3)
    ref3 = _reference(q3, k3, v3)
    assert out3.shape == (B3, Tq3, H3)
    assert jnp.allclose(out3, ref3, atol=ATOL, rtol=RTOL)

    print("KERNEL_OK")
</pallas_src>

<mosaic_0001>
module attributes {stable_mosaic.version = 11 : i64} {
  func.func @_flash_attn_kernel(%arg0: i32, %arg1: i32, %arg2: i32, %arg3: memref<1x8x32xf32, #tpu.memory_space<vmem>>, %arg4: memref<1x8x32xf32, #tpu.memory_space<vmem>>, %arg5: memref<1x8x32xf32, #tpu.memory_space<vmem>>, %arg6: memref<1x8x32xf32, #tpu.memory_space<vmem>>, %arg7: memref<8x32xbf16, #tpu.memory_space<vmem>>, %arg8: memref<8x1xf32, #tpu.memory_space<vmem>>, %arg9: memref<8x1xf32, #tpu.memory_space<vmem>>, %arg10: memref<8x32xf32, #tpu.memory_space<vmem>>) attributes {dimension_semantics = [#tpu.dimension_semantics<parallel>, #tpu.dimension_semantics<parallel>, #tpu.dimension_semantics<arbitrary>], iteration_bounds = array<i64: 2, 1, 1>, scalar_prefetch = 0 : i64, scratch_operands = 4 : i64, tpu.core_type = #tpu.core_type<tc>, window_params = [{transform_indices = @transform_0, window_bounds = array<i64: 1, 8, 32>}, {transform_indices = @transform_1, window_bounds = array<i64: 1, 8, 32>}, {transform_indices = @transform_2, window_bounds = array<i64: 1, 8, 32>}, {transform_indices = @transform_3, window_bounds = array<i64: 1, 8, 32>}]} {
    %c0_i32 = arith.constant 0 : i32
    %0 = arith.cmpi eq, %arg2, %c0_i32 : i32
    %1 = arith.extui %0 : i1 to i32
    %c0_i32_0 = arith.constant 0 : i32
    %2 = arith.cmpi ne, %1, %c0_i32_0 : i32
    scf.if %2 {
      %c0_25 = arith.constant 0 : index
      %c0_26 = arith.constant 0 : index
      %c0_27 = arith.constant 0 : index
      %37 = vector.load %arg3[%c0_25, %c0_26, %c0_27] : memref<1x8x32xf32, #tpu.memory_space<vmem>>, vector<1x8x32xf32>
      %38 = vector.shape_cast %37 : vector<1x8x32xf32> to vector<8x32xf32>
      %cst_28 = arith.constant 0.176776692 : f32
      %39 = vector.broadcast %cst_28 : f32 to vector<8x32xf32>
      %40 = arith.mulf %38, %39 : vector<8x32xf32>
      %41 = arith.truncf %40 : vector<8x32xf32> to vector<8x32xbf16>
      %c0_29 = arith.constant 0 : index
      %c0_30 = arith.constant 0 : index
      %42 = vector.load %arg7[%c0_29, %c0_30] : memref<8x32xbf16, #tpu.memory_space<vmem>>, vector<8x32xbf16>
      tpu.vector_store %arg7[%c0_29, %c0_30], %41 {strides = array<i32>} : memref<8x32xbf16, #tpu.memory_space<vmem>>, vector<8x32xbf16>,
      %cst_31 = arith.constant -1.000000e+30 : f32
      %43 = vector.broadcast %cst_31 : f32 to vector<8x1xf32>
      %c0_32 = arith.constant 0 : index
      %c0_33 = arith.constant 0 : index
      %44 = vector.load %arg8[%c0_32, %c0_33] : memref<8x1xf32, #tpu.memory_space<vmem>>, vector<8x1xf32>
      tpu.vector_store %arg8[%c0_32, %c0_33], %43 {strides = array<i32>} : memref<8x1xf32, #tpu.memory_space<vmem>>, vector<8x1xf32>,
      %cst_34 = arith.constant 0.000000e+00 : f32
      %45 = vector.broadcast %cst_34 : f32 to vector<8x1xf32>
      %c0_35 = arith.constant 0 : index
      %c0_36 = arith.constant 0 : index
      %46 = vector.load %arg9[%c0_35, %c0_36] : memref<8x1xf32, #tpu.memory_space<vmem>>, vector<8x1xf32>
      tpu.vector_store %arg9[%c0_35, %c0_36], %45 {strides = array<i32>} : memref<8x1xf32, #tpu.memory_space<vmem>>, vector<8x1xf32>,
      %cst_37 = arith.constant 0.000000e+00 : f32
      %47 = vector.broadcast %cst_37 : f32 to vector<8x32xf32>
      %c0_38 = arith.constant 0 : index
      %c0_39 = arith.constant 0 : index
      %48 = vector.load %arg10[%c0_38, %c0_39] : memref<8x32xf32, #tpu.memory_space<vmem>>, vector<8x32xf32>
      tpu.vector_store %arg10[%c0_38, %c0_39], %47 {strides = array<i32>} : memref<8x32xf32, #tpu.memory_space<vmem>>, vector<8x32xf32>,
    } else {
    }
    %c0 = arith.constant 0 : index
    %c0_1 = arith.constant 0 : index
    %3 = vector.load %arg7[%c0, %c0_1] : memref<8x32xbf16, #tpu.memory_space<vmem>>, vector<8x32xbf16>
    %c0_2 = arith.constant 0 : index
    %c0_3 = arith.constant 0 : index
    %c0_4 = arith.constant 0 : index
    %4 = vector.load %arg4[%c0_2, %c0_3, %c0_4] : memref<1x8x32xf32, #tpu.memory_space<vmem>>, vector<1x8x32xf32>
    %5 = vector.shape_cast %4 : vector<1x8x32xf32> to vector<8x32xf32>
    %6 = arith.truncf %5 : vector<8x32xf32> to vector<8x32xbf16>
    %c0_5 = arith.constant 0 : index
    %c0_6 = arith.constant 0 : index
    %c0_7 = arith.constant 0 : index
    %7 = vector.load %arg5[%c0_5, %c0_6, %c0_7] : memref<1x8x32xf32, #tpu.memory_space<vmem>>, vector<1x8x32xf32>
    %8 = vector.shape_cast %7 : vector<1x8x32xf32> to vector<8x32xf32>
    %9 = arith.truncf %8 : vector<8x32xf32> to vector<8x32xbf16>
    %cst = arith.constant dense<0.000000e+00> : vector<8x8xf32>
    %10 = tpu.matmul %3, %6, %cst {dimension_numbers = #tpu.dot_dimension_numbers<[1], [1], [0], [0], [0, 0, 1, 0], [], []>} : vector<8x32xbf16>, vector<8x32xbf16>, vector<8x8xf32> -> vector<8x8xf32>
    %c0_8 = arith.constant 0 : index
    %c0_9 = arith.constant 0 : index
    %11 = vector.load %arg8[%c0_8, %c0_9] : memref<8x1xf32, #tpu.memory_space<vmem>>, vector<8x1xf32>
    %cst_10 = arith.constant dense<0xFF800000> : vector<8xf32>
    %12 = vector.multi_reduction <maximumf>, %10, %cst_10 [1] : vector<8x8xf32> to vector<8xf32>
    %13 = vector.shape_cast %12 : vector<8xf32> to vector<8x1xf32>
    %14 = arith.maximumf %11, %13 : vector<8x1xf32>
    %15 = arith.subf %11, %14 : vector<8x1xf32>
    %16 = math.exp %15 : vector<8x1xf32>
    %17 = vector.broadcast %14 : vector<8x1xf32> to vector<8x8xf32>
    %18 = arith.subf %10, %17 : vector<8x8xf32>
    %19 = math.exp %18 : vector<8x8xf32>
    %c0_11 = arith.constant 0 : index
    %c0_12 = arith.constant 0 : index
    %20 = vector.load %arg9[%c0_11, %c0_12] : memref<8x1xf32, #tpu.memory_space<vmem>>, vector<8x1xf32>
    %21 = arith.mulf %16, %20 : vector<8x1xf32>
    %cst_13 = arith.constant dense<0.000000e+00> : vector<8xf32>
    %22 = vector.multi_reduction <add>, %19, %cst_13 [1] : vector<8x8xf32> to vector<8xf32>
    %23 = vector.shape_cast %22 : vector<8xf32> to vector<8x1xf32>
    %24 = arith.addf %21, %23 : vector<8x1xf32>
    %c0_14 = arith.constant 0 : index
    %c0_15 = arith.constant 0 : index
    %25 = vector.load %arg9[%c0_14, %c0_15] : memref<8x1xf32, #tpu.memory_space<vmem>>, vector<8x1xf32>
    tpu.vector_store %arg9[%c0_14, %c0_15], %24 {strides = array<i32>} : memref<8x1xf32, #tpu.memory_space<vmem>>, vector<8x1xf32>,
    %c0_16 = arith.constant 0 : index
    %c0_17 = arith.constant 0 : index
    %26 = vector.load %arg10[%c0_16, %c0_17] : memref<8x32xf32, #tpu.memory_space<vmem>>, vector<8x32xf32>
    %27 = vector.broadcast %16 : vector<8x1xf32> to vector<8x32xf32>
    %28 = arith.mulf %27, %26 : vector<8x32xf32>
    %29 = arith.truncf %19 : vector<8x8xf32> to vector<8x8xbf16>
    %cst_18 = arith.constant dense<0.000000e+00> : vector<8x32xf32>
    %30 = tpu.matmul %29, %9, %cst_18 {dimension_numbers = #tpu.dot_dimension_numbers<[1], [0], [0], [1], [0, 0, 1, 1], [], []>} : vector<8x8xbf16>, vector<8x32xbf16>, vector<8x32xf32> -> vector<8x32xf32>
    %31 = arith.addf %28, %30 : vector<8x32xf32>
    %c0_19 = arith.constant 0 : index
    %c0_20 = arith.constant 0 : index
    %32 = vector.load %arg10[%c0_19, %c0_20] : memref<8x32xf32, #tpu.memory_space<vmem>>, vector<8x32xf32>
    tpu.vector_store %arg10[%c0_19, %c0_20], %31 {strides = array<i32>} : memref<8x32xf32, #tpu.memory_space<vmem>>, vector<8x32xf32>,
    %c0_21 = arith.constant 0 : index
    %c0_22 = arith.constant 0 : index
    %33 = vector.load %arg8[%c0_21, %c0_22] : memref<8x1xf32, #tpu.memory_space<vmem>>, vector<8x1xf32>
    tpu.vector_store %arg8[%c0_21, %c0_22], %14 {strides = array<i32>} : memref<8x1xf32, #tpu.memory_space<vmem>>, vector<8x1xf32>,
    %c0_i32_23 = arith.constant 0 : i32
    %34 = arith.cmpi eq, %arg2, %c0_i32_23 : i32
    %35 = arith.extui %34 : i1 to i32
    %c0_i32_24 = arith.constant 0 : i32
    %36 = arith.cmpi ne, %35, %c0_i32_24 : i32
    scf.if %36 {
      %c0_25 = arith.constant 0 : index
      %c0_26 = arith.constant 0 : index
      %37 = vector.load %arg9[%c0_25, %c0_26] : memref<8x1xf32, #tpu.memory_space<vmem>>, vector<8x1xf32>
      %38 = tpu.reciprocal %37 {approx = true} : vector<8x1xf32> -> vector<8x1xf32>
      %c0_27 = arith.constant 0 : index
      %c0_28 = arith.constant 0 : index
      %39 = vector.load %arg10[%c0_27, %c0_28] : memref<8x32xf32, #tpu.memory_space<vmem>>, vector<8x32xf32>
      %40 = vector.broadcast %38 : vector<8x1xf32> to vector<8x32xf32>
      %41 = arith.mulf %39, %40 : vector<8x32xf32>
      %c0_29 = arith.constant 0 : index
      %c0_30 = arith.constant 0 : index
      %c0_31 = arith.constant 0 : index
      %42 = vector.load %arg6[%c0_29, %c0_30, %c0_31] : memref<1x8x32xf32, #tpu.memory_space<vmem>>, vector<1x8x32xf32>
      %43 = vector.shape_cast %42 : vector<1x8x32xf32> to vector<8x32xf32>
      %44 = vector.shape_cast %41 : vector<8x32xf32> to vector<1x8x32xf32>
      tpu.vector_store %arg6[%c0_29, %c0_30, %c0_31], %44 {strides = array<i32>} : memref<1x8x32xf32, #tpu.memory_space<vmem>>, vector<1x8x32xf32>,
    } else {
    }
    return
  }
  func.func @transform_0(%arg0: i32, %arg1: i32, %arg2: i32) -> (i32, i32, i32) {
    %c0_i32 = arith.constant 0 : i32
    %c0_i32_0 = arith.constant 0 : i32
    return %arg0, %arg1, %c0_i32 : i32, i32, i32
  }
  func.func @transform_1(%arg0: i32, %arg1: i32, %arg2: i32) -> (i32, i32, i32) {
    %c0_i32 = arith.constant 0 : i32
    %c0_i32_0 = arith.constant 0 : i32
    return %arg0, %arg2, %c0_i32 : i32, i32, i32
  }
  func.func @transform_2(%arg0: i32, %arg1: i32, %arg2: i32) -> (i32, i32, i32) {
    %c0_i32 = arith.constant 0 : i32
    %c0_i32_0 = arith.constant 0 : i32
    return %arg0, %arg2, %c0_i32 : i32, i32, i32
  }
  func.func @transform_3(%arg0: i32, %arg1: i32, %arg2: i32) -> (i32, i32, i32) {
    %c0_i32 = arith.constant 0 : i32
    %c0_i32_0 = arith.constant 0 : i32
    return %arg0, %arg1, %c0_i32 : i32, i32, i32
  }
}

</mosaic_0001>

<bundles_post_ra>
// kernel: tpu_custom_call.1
= control target key start
LH: loop header
LB: loop body
LE: loop exit
PB: predicated region body
PF: predicated region fallthrough
CT: control target
= control target key end

     0   :  { %s1023_s0 = inlined_call_operand.hbm [shape: f32[2,8,32], index: 0, kind: input, shape index: {}]   ;;  %s1024_s1 = inlined_call_operand.hbm [shape: f32[2,8,32], index: 1, kind: input, shape index: {}]   ;;  %s1025_s2 = inlined_call_operand.hbm [shape: f32[2,8,32], index: 2, kind: input, shape index: {}]   ;;  %s1026_s3 = inlined_call_operand.hbm [shape: f32[2,8,32], index: 3, kind: output, shape index: {}]  }
   0x1   :  { %1029 = sst [smem:[#allocation19_spill]] %s1024_s1 }
   0x2   :  { %8 = vsyncpa [#allocation7], 0 }
   0x3   :  { %10 = vsyncpa [#allocation7 + $0x1], 0 }
   0x4   :  { %11 = vsyncpa [#allocation10], 0 }
   0x5   :  { %13 = vsyncpa [#allocation10 + $0x1], 0 }
   0x6   :  { %14 = vsyncpa [#allocation8], 0 }
   0x7   :  { %16 = vsyncpa [#allocation8 + $0x1], 0  ;;  %s853_s12 = smov 0   ;;  %s855_s13 = smov 0  }
   0x8   :  { %s857_s14 = smov 0   ;;  %s859_s15 = smov 0  }
   0x9   :  { %s861_s16 = smov 0   ;;  %s863_s17 = smov 0  }
   0xa LB: > { %1030 = sst [smem:[#allocation16_spill]] %s824_s16  ;;  %s884_s18 = sadd.s32 4294967295, %s828_s17   ;;  %s828_s17 = sphi %s863_s17, %s22_s17   ;;  %s824_s16 = sphi %s861_s16, %s1042_s16   ;;  %s820_s15 = sphi %s859_s15, %s1041_s15   ;;  %s816_s14 = sphi %s857_s14, %s1045_s14   ;;  %s812_s13 = sphi %s855_s13, %s1044_s13   ;;  %s808_s12 = sphi %s853_s12, %s1043_s12  }
   0xb   : > { %s548_s19 = sadd.s32 4294967294, %s828_s17   ;;  %s41_s20 = sadd.s32 1, %s824_s16 }
   0xc   : > { %s50_s21 = sadd.s32 1, %s816_s14  ;;  %p43_p0 = scmp.ge.s32.totalorder %s41_s20, 2 }
   0xd   : > { %p57_p1 = scmp.ne.s32.totalorder %s816_s14, %s812_s13  ;;  %p58_p2 = scmp.eq.s32.totalorder %s828_s17, 0 }
   0xe   : > { %p63_p3 = scmp.ne.s32.totalorder %s812_s13, %s808_s12  ;;  %s1047_s20 = smov (%p43_p0, %s41_s20), 0 }
   0xf   : > { %1031 = sst [smem:[#allocation17_spill]] %s1047_s20  ;;  %p896_p4 = por %p58_p2, %p57_p1 }
  0x10   : > { %p64_p5 = scmp.eq.s32.totalorder %s884_s18, 0  ;;  %s45_s23 = ssub.s32 %s824_s16, %s1047_s20 }
  0x11   : > { %p145_p6 = scmp.eq.s32.totalorder %s884_s18, 1  ;;  %p48_p7 = scmp.eq.s32.totalorder %s45_s23, 0 }
  0x12   : > { %p904_p8 = por %p64_p5, %p63_p3  ;;  %p151_p10 = scmp.eq.s32.totalorder %s548_s19, 1 }
  0x13   : > { %p908_p9 = por %p145_p6, %p57_p1  ;;  %p550_p12 = scmp.ge.s32.totalorder %s828_s17, 2 }
  0x14   : > { %s913_s26 = scalar_select %p48_p7, %s816_s14, %s50_s21  }
  0x15   : > { %p915_p11 = por %p151_p10, %p63_p3  ;;  %p590_p13 = scmp.lt.s32.totalorder %s828_s17, 2 }
  0x16   : > { %1035 = sst [smem:[#allocation18_spill]] %s913_s26  ;;  %s171_s28 = sand.u32 1, %s816_s14  }
  0x17   : > { %s551_s29 = sshll.u32 %s171_s28, 3  ;;  %s552_s30 = sshll.u32 %s824_s16, 3 }
  0x18   : > { %p925_p0 = pnand %p590_p13, %p896_p4  ;;  %s191_s5 = sand.u32 1, %s828_s17  }
  0x19   : > { %s1038_s1 = sld [smem:[#allocation19_spill]]  ;;  %s195_s10 = scalar_lea.vmem [#allocation9], %s551_s29 }
  0x1a   : > { %s204_s11 = sshll.u32 %s195_s10, 4  ;;  %s192_s19 = scalar_lea.sflag [#allocation10], %s191_s5  ;;  %s205_s11 = int_to_ptr.vmem [resolvable:$true] %s204_s11 }
  0x1b   : > { %p557_p1 = scmp.ge.s32.totalorder %s828_s17, 1  ;;  %p229_p2 = scmp.lt.s32.totalorder %s828_s17, 3 }
  0x1c   : > { %s180_s6 = scalar_lea.hbm %s1023_s0, %s552_s30  ;;  %s172_s10 = scalar_lea.sflag [#allocation7], %s171_s28 }
  0x1d   : > { %p937_p3 = pnand %p557_p1, %p229_p2  ;;  %s182_s7 = sshll.u32 %s180_s6, 4  ;;  %s183_s7 = int_to_ptr.hbm [resolvable:$true] %s182_s7 }
  0x1e   : > { %s215_s16 = scalar_lea.vmem [#allocation11], %s551_s29  ;;  %s954_s22 = sand.u32 (!%p937_p3), 1, %s812_s13  }
  0x1f   : > { %s200_s8 = scalar_lea.hbm %s1038_s1, %s552_s30  ;;  %s224_s26 = sshll.u32 %s215_s16, 4  ;;  %s225_s26 = int_to_ptr.vmem [resolvable:$true] %s224_s26 }
  0x20   : > { %s202_s9 = sshll.u32 %s200_s8, 4  ;;  %s175_s8 = scalar_lea.vmem [#allocation6], %s551_s29  ;;  %s203_s9 = int_to_ptr.hbm [resolvable:$true] %s202_s9 }
  0x21   : > { %582 = dma.hbm_to_vmem [thread:$0]  (!%p925_p0), %s203_s9, 128, %s205_s11, %s192_s19  }
  0x22   : > { %s184_s1 = sshll.u32 %s175_s8, 4  ;;  %s220_s11 = scalar_lea.hbm %s1025_s2, %s552_s30  ;;  %s185_s1 = int_to_ptr.vmem [resolvable:$true] %s184_s1 }
  0x23   : > { %579 = dma.hbm_to_vmem [thread:$0]  (!%p925_p0), %s183_s7, 128, %s185_s1, %s172_s10  }
  0x24   : > { %s222_s20 = sshll.u32 %s220_s11, 4  ;;  %233 = sbr.rel (%p937_p3) target bundleno = 659 (0x293), region = 32  ;;  %s223_s20 = int_to_ptr.hbm [resolvable:$true] %s222_s20 }
  0x25   : > { %585 = dma.hbm_to_vmem [thread:$0]  (!%p925_p0), %s223_s20, 128, %s225_s26, %s192_s19  }
  0x26   : > { %s957_s1 = sshll.u32 (!%p937_p3), %s954_s22, 3  ;;  %s236_s28 = scalar_lea.sflag (!%p937_p3), [#allocation7], %s954_s22 }
  0x27   : > { %s239_s30 = scalar_lea.vmem (!%p937_p3), [#allocation6], %s957_s1 }
  0x29   : > { %795 = dma.done.wait (%p904_p8), %s236_s28, 128  }
  0x2a   : > { %797 = vsyncadd (%p904_p8), %s236_s28, 4294967168  ;;  %s245_s16 = sand.u32 1, %s884_s18   ;;  %s249_s26 = scalar_lea.vmem [#allocation9], %s957_s1 }
  0x2b   : > { %s246_s20 = scalar_lea.sflag [#allocation10], %s245_s16 }
  0x2c   : > { %799 = dma.done.wait (%p904_p8), %s246_s20, 256  }
  0x2d   : > { %801 = vsyncadd (%p904_p8), %s246_s20, 4294967040  ;;  %vm306_vm0 = vcmask 261120   ;;  %v830_v0 = vmov 0.0   ;;  %v309_v1 = vld [vmem:[%s249_s26] sm:$0xff]  ;;  %v298_v2 = vld [vmem:[%s239_s30] sm:$0xff]  ;;  %vm301_vm1 = vcmask 257024  }
  0x2e   : > { %307 = vst.msk [vmem:[#allocation5] sm:$0xff] %vm306_vm0, %v830_v0  ;;  %v310_v3 = vpack.c.bf16 %v309_v1, %v309_v1  ;;  %v299_v4 = vmul.f32 0.17677669, %v298_v2  ;;  %vm303_vm2 = vcmask 7168   ;;  %v831_v8 = vmov -1e+30  }
  0x2f   : > { %304 = vst.msk [vmem:[#allocation3] sm:$0xff] %vm303_vm2, %v831_v8  ;;  %vm334_vm3 = vcmask 64512   ;;  %v832_v12 = vmov 0   ;;  %s259_s18 = scalar_lea.vmem [#allocation11], %s957_s1  ;;  %vm369_vm4 = vcmask 1043456   ;;  %s565_s24 = sshll.u32 %s820_s15, 3 }
  0x30   : > { %v318_v5 = vsel %vm306_vm0, %v310_v3, 0  ;;  %v300_v6 = vpack.c.bf16 %v299_v4, %v299_v4  ;;  %305 = vst.msk [vmem:[#allocation4] sm:$0xff] %vm303_vm2, %v830_v0  ;;  %643 = vset.pattern.permute.xlu0 %v832_v12  ;;  %644 = vset.pattern.permute.xlu1 %v832_v12  ;;  %v311_v17 = vld [vmem:[%s259_s18] sm:$0xff]  ;;  %s414_s19 = scalar_lea.hbm %s1026_s3, %s565_s24  ;;  %s292_s21 = scalar_lea.vmem [#allocation12], %s957_s1 }
  0x31   : > { %327 = vmatpush.bf16.xpose.msra.mxu0 %v318_v5  ;;  %645 = vset.pattern.permute.xlu2 %v832_v12  ;;  %v312_v18 = vpack.c.bf16 %v311_v17, %v311_v17  ;;  %s416_s23 = sshll.u32 %s292_s21, 4  ;;  %s418_s6 = sshll.u32 %s414_s19, 4  ;;  %s417_s23 = int_to_ptr.vmem [resolvable:$true] %s416_s23  ;;  %s419_s6 = int_to_ptr.hbm [resolvable:$true] %s418_s6 }
  0x32   : > { %302 = vst.msk [vmem:[#allocation2] sm:$0xf] %vm301_vm1, %v300_v6  ;;  %s403_s7 = scalar_lea.sflag [#allocation8], %s954_s22  ;;  %s756_s8 = sshra.s32 %s419_s6, 4  ;;  %s757_s8 = int_to_ptr.hbm [resolvable:$true] %s756_s8 }
  0x33   : > { %v371_v19 = vsel %vm369_vm4, %v312_v18, 0  ;;  %s758_s10 = scalar_lea.hbm %s757_s8, 8  ;;  %s762_s9 = scalar_lea.hbm %s1026_s3, 16 }
  0x34   : > { %380 = vmatpush.bf16.msra.mxu1 %v371_v19  ;;  %p759_p4 = scmp.ne.s32.totalorder %s757_s8, %s758_s10  ;;  %p763_p7 = scmp.lt.s32.totalorder %s757_s8, %s1026_s3 }
  0x35   : > { %v358_v36 = vld [vmem:[#allocation5] sm:$0xff]  ;;  %p764_p8 = scmp.lt.s32.totalorder %s762_s9, %s758_s10 }
  0x36   : > { %v333_v13 = vld [vmem:[#allocation3] sm:$0xff]  ;;  %p760_p5 = pnand %p759_p4, %p908_p9 }
  0x37   : > { %v350_v28 = vld [vmem:[#allocation4] sm:$0xff]  ;;  %p765_p10 = por %p764_p8, %p763_p7 }
  0x38   : > { %p761_p6 = pneg %p760_p5 }
  0x39   : > { %v308_v7 = vld [vmem:[#allocation2] sm:$0xf] }
  0x3a   : > { %562 = vmatmul.msk.bf16.vlgmr.msra.gmra.mxu0 %vm306_vm0, %v308_v7  ;;  %p766_p13 = pnand %p765_p10, %p761_p6 }
  0xb7   : > { %v329_v9 = vpop.f32.mrf.mxu0 }
  0xb8   : > { %v335_v10 = vsel %vm334_vm3, %v329_v9, -inf }
  0xb9   : > { %336 = vmax.xlane.f32.xlu0 %v335_v10 }
  0xbf   : > { %v331_v11 = vpop.f32.mrf.mxu0 }
 0x12c   : > { %v337_v14 = vpop.xlane.xlu0 %336 }
 0x12d   : > { %v338_v15 = vmax.f32 %v333_v13, %v337_v14 }
 0x12f   : > { %v339_v16 = vsub.f32 %v333_v13, %v338_v15  ;;  %388 = vst.msk [vmem:[#allocation3] sm:$0xff] %vm303_vm2, %v338_v15  ;;  %344 = vperm.xlu0 %643, %v338_v15  }
 0x131   : > { %v340_v26 = vmul.f32 1.442695, %v339_v16 }
 0x1a1   : > { %v345_v20 = vpop.permute.xlu0 %344 }
 0x1a2   : > { %v347_v21 = vsub.f32 %v329_v9, %v345_v20 }
 0x1a4   : > { %v348_v22 = vmul.f32 1.442695, %v347_v21 }
 0x1a6   : > { %646 = vpow2.f32 %v348_v22 }
 0x1a7   : > { %648 = vpow2.f32 %v340_v26 }
 0x1ac   : > { %v647_v23 = vpop.eup %646 }
 0x1ad   : > { %v352_v24 = vsel %vm334_vm3, %v647_v23, 0.0  ;;  %v365_v25 = vpack.c.bf16 %v647_v23, %v647_v23  ;;  %v649_v27 = vpop.eup %648 }
 0x1ae   : > { %353 = vadd.xlane.f32.xlu1 %v352_v24  ;;  %v351_v29 = vmul.f32 %v649_v27, %v350_v28 }
 0x1af   : > { %563 = vmatmul.msk.bf16.vlgmr.msra.gmra.mxu1 %vm334_vm3, %v365_v25 }
 0x1c7   : > { %361 = vperm.xlu1 %644, %v649_v27  }
 0x221   : > { %v354_v30 = vpop.xlane.xlu1 %353 }
 0x222   : > { %v355_v31 = vadd.f32 %v354_v30, %v351_v29 }
 0x224   : > { %357 = vst.msk [vmem:[#allocation4] sm:$0xff] %vm303_vm2, %v355_v31 }
 0x22b   : > { %v392_v32 = vld [vmem:[#allocation4] sm:$0xff] }
 0x22c   : > { %v382_v33 = vpop.f32.mrf.mxu1  ;;  %650 = vrcp.f32 %v392_v32 }
 0x232   : > { %v651_v34 = vpop.eup %650 }
 0x233   : > { %397 = vperm.xlu2 %645, %v651_v34  }
 0x234   : > { %v384_v35 = vpop.f32.mrf.mxu1 }
 0x239   : > { %v362_v37 = vpop.permute.xlu1 %361 }
 0x23a   : > { %v364_v38 = vmul.f32 %v362_v37, %v358_v36 }
 0x23c   : > { %v386_v39 = vadd.f32 %v382_v33, %v364_v38 }
 0x23e   : > { %387 = vst.msk [vmem:[#allocation5] sm:$0xff] %vm306_vm0, %v386_v39 }
 0x245   : > { %v394_v40 = vld [vmem:[#allocation5] sm:$0xff] }
 0x28d   : > { %v398_v41 = vpop.permute.xlu2 %397 }
 0x28e   : > { %v400_v42 = vmul.f32 %v398_v41, %v394_v40 }
 0x290   : > { %401 = vst.msk [vmem:[%s292_s21] sm:$0xff] %vm306_vm0, %v400_v42 }
 0x291   : > { %769 = shalt.err (!%p766_p13)
}
 0x292   : > { %574 = dma.vmem_to_hbm [thread:$0]  (%p908_p9), %s417_s23, 128, %s419_s6, %s403_s7  }
 0x293 PF: > { %s430_s22 = sand.u32 1, %s808_s12   ;;  %p587_p0 = pnand %p550_p12, %p915_p11 }
 0x294   : > { %s431_s28 = scalar_lea.sflag [#allocation8], %s430_s22 }
 0x295   : > { %p588_p1 = pneg %p587_p0 }
 0x297   : > { %803 = dma.done.wait (%p588_p1), %s431_s28, 128  }
 0x298   : > { %805 = vsyncadd (%p588_p1), %s431_s28, 4294967168  ;;  %s22_s17 = sadd.s32 1, %s828_s17   ;;  %s1040_s30 = sld [smem:[#allocation18_spill]] }
 0x299   : > { %p19_p2 = scmp.ge.s32.totalorder %s22_s17, 4   ;;  %s1041_s15 = sld [smem:[#allocation16_spill]] }
 0x29a   : > { %s1042_s16 = sld [smem:[#allocation17_spill]]  ;;  %s1043_s12 = smov %s812_s13 }
 0x29b   : > { %s1044_s13 = smov %s816_s14  ;;  %21 = sbr.rel (!%p19_p2) target bundleno = 10 (0xa), region = 109 }
 0x29e   : > { %s1045_s14 = smov %s1040_s30 }
 0x2a0   :  { %437 = vsyncpa [#allocation7], 1 }
 0x2a1   :  { %439 = vsyncpa [#allocation7 + $0x1], 1 }
 0x2a2   :  { %440 = vsyncpa [#allocation10], 1 }
 0x2a3   :  { %442 = vsyncpa [#allocation10 + $0x1], 1 }
 0x2a4   :  { %443 = vsyncpa [#allocation8], 1 }
 0x2a5   :  { %445 = vsyncpa [#allocation8 + $0x1], 1 }

</bundles_post_ra>
